<compile_context>
chip_gen: v6e
topology: v6e:2x2x1
jax: 0.10.0
libtpu: 0.0.40
codegen_flags: <defaults>
</compile_context>

<pallas_src>
import functools
import math

import jax
import jax.numpy as jnp
from jax.experimental import pallas as pl
from jax.experimental.pallas import tpu as pltpu


def _round_up(x, m):
    return (x + m - 1) // m * m


def _pd_kernel(tile_ref, x_ref, w_ref, o_ref, *, N, Cin, Cout, R):
    """One batch tile of TB = TBr * R logical rows.

    tile_ref: [TBr, R]       int32  resident; tile id of logical row (R*i + j)
    x_ref:    [TBr, R*Cin]   bf16   R consecutive rows packed per super-row
    w_ref:    [Cin, N*Cout]  bf16   resident packed weights
    o_ref:    [TBr, R*Cout]  f32    lane-dense packed output
    """
    TBr = x_ref.shape[0]
    w = w_ref[...]
    for j in range(R):                                    # static unroll, R small
        xj = x_ref[:, j * Cin:(j + 1) * Cin]              # [TBr, Cin]
        yj = jnp.dot(xj, w, preferred_element_type=jnp.float32)   # [TBr, N*Cout]
        # Hoist the tile-id broadcast out of the select loop (JAX does not CSE
        # broadcast_in_dim).
        tile_b = jnp.broadcast_to(tile_ref[:, j:j + 1], (TBr, Cout))
        # Tile masks are disjoint + exhaustive -> select-sum over lane groups.
        out = jnp.where(tile_b == 0, yj[:, 0:Cout], 0.0)
        for t in range(1, N):
            out = out + jnp.where(tile_b == t, yj[:, t * Cout:(t + 1) * Cout], 0.0)
        # Module bias is torch.zeros(Cout) -> identity, skipped.
        o_ref[:, j * Cout:(j + 1) * Cout] = jnp.where(out > 0, out, 0.2 * out)


def _compute_tile_ids(coords0, *, N, layer_num, grid_arrangement_str):
    """get_affine_transform for the first coord_batch_size coords (plain JAX)."""
    H = int(math.sqrt(N))
    if grid_arrangement_str == 'gray_code':
        A = 2.0 if layer_num == 1 else float(2 ** (layer_num - 1))
        b = 0.5
    elif grid_arrangement_str == 'fine_to_coarse':
        A = float(2 ** (10 - layer_num))
        b = 0.0
    else:
        # TODO(synk): 'quad_tree' leaves _A/_b undefined in the PyTorch module.
        raise NotImplementedError(grid_arrangement_str)
    aff = coords0 * A + b
    xi = jnp.mod(jnp.floor(aff[:, 0]).astype(jnp.int32), H)
    yi = jnp.mod(jnp.floor(aff[:, 1]).astype(jnp.int32), H)
    return (H * xi + yi).astype(jnp.int32)                # [coord_B]


def positional_dependent_layer(in_feats, in_coords, weights, *,
                               N, layer_num=1, coord_batch_size=1,
                               hidden_layers=4, grid_arrangement_str='gray_code',
                               batch_tile=8192, compute_dtype=jnp.bfloat16,
                               vmem_budget_bytes=16 * 1024 * 1024):
    B_total, Cin = in_feats.shape
    Cout = weights.shape[1]
    H = int(math.sqrt(N))
    assert H * H == N, "N must be a perfect square (tile grid is H x H)"
    # TODO(synk): torch's remainder path (B % coord_B != 0) broadcasts a
    # stale-size cached tile_id and would itself error; we require divisibility.
    assert B_total % coord_batch_size == 0

    tid = _compute_tile_ids(in_coords[:coord_batch_size], N=N,
                            layer_num=layer_num,
                            grid_arrangement_str=grid_arrangement_str)

    # Row-packing factor so the f32 output block is a multiple of 128 lanes.
    R = 1 if Cout % 128 == 0 else 128 // math.gcd(Cout, 128)
    q = math.lcm(8 * R, coord_batch_size)        # TB alignment quantum

    itemsize = jnp.dtype(compute_dtype).itemsize

    def vmem_bytes(tb):
        tbr = tb // R
        x_b = 2 * tbr * _round_up(R * Cin, 128) * itemsize     # input (dbl-buffered)
        o_b = 2 * tbr * R * Cout * 4                            # output (dbl-buffered)
        y_b = 2 * tbr * _round_up(N * Cout, 128) * 4            # matmul intermediates
        t_b = 2 * tbr * 128 * 4                                  # resident tile ids (lane-padded)
        w_b = 2 * Cin * _round_up(N * Cout, 128) * itemsize      # resident packed weights
        return x_b + o_b + y_b + t_b + w_b

    # Biggest aligned batch tile up to `batch_tile` that fits the VMEM budget.
    TB = max(q, min(batch_tile, _round_up(B_total, q)) // q * q)
    while TB > q and vmem_bytes(TB) > vmem_budget_bytes:
        TB = max(q, (TB // 2) // q * q)
    # Keep >= 2 grid steps when there is enough work (v7x has 2 TensorCores).
    while TB > q and pl.cdiv(B_total, TB) < 2:
        TB = max(q, (TB // 2) // q * q)

    B_pad = _round_up(B_total, TB)
    TBr = TB // R
    grid = (B_pad // TB,)

    # Pack [N, Cout, Cin] -> [Cin, N*Cout]: w_packed[i, t*Cout + c] = W[t, c, i].
    w_packed = jnp.transpose(weights, (2, 0, 1)).reshape(Cin, N * Cout)
    w_packed = w_packed.astype(compute_dtype)

    x = in_feats.astype(compute_dtype)
    if B_pad != B_total:
        x = jnp.pad(x, ((0, B_pad - B_total), (0, 0)))
    x_packed = x.reshape(B_pad // R, R * Cin)      # free view: rows are contiguous

    # Resident tile-id block: identical pattern in every grid step since
    # TB % coord_batch_size == 0.
    tile_block = jnp.tile(tid, TB // coord_batch_size).reshape(TBr, R)

    kernel = functools.partial(_pd_kernel, N=N, Cin=Cin, Cout=Cout, R=R)

    out = pl.pallas_call(
        kernel,
        out_shape=jax.ShapeDtypeStruct((B_pad // R, R * Cout), jnp.float32),
        grid_spec=pltpu.PrefetchScalarGridSpec(
            num_scalar_prefetch=0,
            grid=grid,
            in_specs=[
                # Constant index maps -> DMA'd once, resident across the grid.
                pl.BlockSpec((TBr, R), lambda b: (0, 0)),             # tile ids
                pl.BlockSpec((TBr, R * Cin), lambda b: (b, 0)),       # features
                pl.BlockSpec((Cin, N * Cout), lambda b: (0, 0)),      # packed weights
            ],
            out_specs=pl.BlockSpec((TBr, R * Cout), lambda b: (b, 0)),
        ),
        compiler_params=pltpu.CompilerParams(
            dimension_semantics=("parallel",),
            vmem_limit_bytes=32 * 1024 * 1024),
    )(tile_block, x_packed, w_packed)

    out = out.reshape(B_pad, Cout)[:B_total]       # free view back + drop padding
    if layer_num != hidden_layers + 1:
        return out, in_coords
    return out


def _reference(in_feats, in_coords, weights, *, N, layer_num,
               coord_batch_size, grid_arrangement_str,
               compute_dtype=jnp.bfloat16):
    """Pure-JAX reference with the same operand rounding, f32 accumulation."""
    B_total = in_feats.shape[0]
    tid = _compute_tile_ids(in_coords[:coord_batch_size], N=N,
                            layer_num=layer_num,
                            grid_arrangement_str=grid_arrangement_str)
    tile_rows = jnp.tile(tid, B_total // coord_batch_size)      # [B]
    x = in_feats.astype(compute_dtype).astype(jnp.float32)
    w = weights.astype(compute_dtype).astype(jnp.float32)
    w_sel = w[tile_rows]                                        # [B, Cout, Cin]
    y = jnp.einsum('bi,boi->bo', x, w_sel)                      # bias is zeros -> skipped
    return jnp.where(y > 0, y, 0.2 * y)


if __name__ == "__main__":
    # Module config: N=4 weight tiles (H=2 grid), Cin=Cout=32, layer_num=1,
    # gray_code arrangement, coord_batch_size=4, hidden_layers=4.
    N = 4
    Cin = 32
    Cout = 32
    layer_num = 1
    coord_B = 4
    hidden_layers = 4

    def run_case(B_total, seed):
        k_feat, k_coord, k_w = jax.random.split(jax.random.PRNGKey(seed), 3)
        in_feats = jax.random.normal(k_feat, (B_total, Cin), dtype=jnp.float32)
        in_coords = jax.random.uniform(k_coord, (B_total, 2), dtype=jnp.float32)
        # kaiming_uniform_ (a=0): bound = sqrt(2)*sqrt(3/fan_in), fan_in = Cin.
        bound = math.sqrt(6.0 / Cin)
        weights = jax.random.uniform(k_w, (N, Cout, Cin), dtype=jnp.float32,
                                     minval=-bound, maxval=bound)

        out, coords_pt = positional_dependent_layer(
            in_feats, in_coords, weights,
            N=N, layer_num=layer_num, coord_batch_size=coord_B,
            hidden_layers=hidden_layers, grid_arrangement_str='gray_code')
        out = jax.block_until_ready(out)

        ref = _reference(in_feats, in_coords, weights,
                         N=N, layer_num=layer_num, coord_batch_size=coord_B,
                         grid_arrangement_str='gray_code')

        assert out.shape == (B_total, Cout)
        assert coords_pt.shape == (B_total, 2)
        assert jnp.allclose(out, ref, rtol=1e-3, atol=1e-3), \
            float(jnp.max(jnp.abs(out - ref)))

    run_case(8, 0)        # single-step grid, full padding path
    run_case(1000, 1)     # multi-step grid (2 tiles), padded tail rows
    print("KERNEL_OK")
</pallas_src>

<mosaic_0001>
module attributes {stable_mosaic.version = 11 : i64} {
  func.func @_pd_kernel(%arg0: i32, %arg1: memref<8x4xi32, #tpu.memory_space<vmem>>, %arg2: memref<8x128xbf16, #tpu.memory_space<vmem>>, %arg3: memref<32x128xbf16, #tpu.memory_space<vmem>>, %arg4: memref<8x128xf32, #tpu.memory_space<vmem>>) attributes {dimension_semantics = [#tpu.dimension_semantics<parallel>], iteration_bounds = array<i64: 1>, scalar_prefetch = 0 : i64, scratch_operands = 0 : i64, tpu.core_type = #tpu.core_type<tc>, window_params = [{pipeline_mode = #tpu.pipeline_mode<synchronous>, transform_indices = @transform_0, window_bounds = array<i64: 8, 4>}, {transform_indices = @transform_1, window_bounds = array<i64: 8, 128>}, {pipeline_mode = #tpu.pipeline_mode<synchronous>, transform_indices = @transform_2, window_bounds = array<i64: 32, 128>}, {transform_indices = @transform_3, window_bounds = array<i64: 8, 128>}]} {
    %c0 = arith.constant 0 : index
    %c0_0 = arith.constant 0 : index
    %0 = vector.load %arg3[%c0, %c0_0] : memref<32x128xbf16, #tpu.memory_space<vmem>>, vector<32x128xbf16>
    %c0_1 = arith.constant 0 : index
    %c0_2 = arith.constant 0 : index
    %1 = vector.load %arg2[%c0_1, %c0_2] : memref<8x128xbf16, #tpu.memory_space<vmem>>, vector<8x32xbf16>
    %cst = arith.constant dense<0.000000e+00> : vector<8x128xf32>
    %2 = tpu.matmul %1, %0, %cst {dimension_numbers = #tpu.dot_dimension_numbers<[1], [0], [0], [1], [0, 0, 1, 1], [], []>} : vector<8x32xbf16>, vector<32x128xbf16>, vector<8x128xf32> -> vector<8x128xf32>
    %c0_3 = arith.constant 0 : index
    %c0_4 = arith.constant 0 : index
    %3 = vector.load %arg1[%c0_3, %c0_4] : memref<8x4xi32, #tpu.memory_space<vmem>>, vector<8x1xi32>
    %4 = vector.shape_cast %3 : vector<8x1xi32> to vector<8x1xi32>
    %5 = vector.broadcast %4 : vector<8x1xi32> to vector<8x32xi32>
    %c0_i32 = arith.constant 0 : i32
    %6 = vector.broadcast %c0_i32 : i32 to vector<8x32xi32>
    %7 = arith.cmpi eq, %5, %6 : vector<8x32xi32>
    %8 = vector.extract_strided_slice %2 {offsets = [0, 0], sizes = [8, 32], strides = [1, 1]} : vector<8x128xf32> to vector<8x32xf32>
    %cst_5 = arith.constant 0.000000e+00 : f32
    %9 = vector.broadcast %cst_5 : f32 to vector<8x32xf32>
    %10 = arith.select %7, %8, %9 : vector<8x32xi1>, vector<8x32xf32>
    %c1_i32 = arith.constant 1 : i32
    %11 = vector.broadcast %c1_i32 : i32 to vector<8x32xi32>
    %12 = arith.cmpi eq, %5, %11 : vector<8x32xi32>
    %13 = vector.extract_strided_slice %2 {offsets = [0, 32], sizes = [8, 32], strides = [1, 1]} : vector<8x128xf32> to vector<8x32xf32>
    %cst_6 = arith.constant 0.000000e+00 : f32
    %14 = vector.broadcast %cst_6 : f32 to vector<8x32xf32>
    %15 = arith.select %12, %13, %14 : vector<8x32xi1>, vector<8x32xf32>
    %16 = arith.addf %10, %15 : vector<8x32xf32>
    %c2_i32 = arith.constant 2 : i32
    %17 = vector.broadcast %c2_i32 : i32 to vector<8x32xi32>
    %18 = arith.cmpi eq, %5, %17 : vector<8x32xi32>
    %19 = vector.extract_strided_slice %2 {offsets = [0, 64], sizes = [8, 32], strides = [1, 1]} : vector<8x128xf32> to vector<8x32xf32>
    %cst_7 = arith.constant 0.000000e+00 : f32
    %20 = vector.broadcast %cst_7 : f32 to vector<8x32xf32>
    %21 = arith.select %18, %19, %20 : vector<8x32xi1>, vector<8x32xf32>
    %22 = arith.addf %16, %21 : vector<8x32xf32>
    %c3_i32 = arith.constant 3 : i32
    %23 = vector.broadcast %c3_i32 : i32 to vector<8x32xi32>
    %24 = arith.cmpi eq, %5, %23 : vector<8x32xi32>
    %25 = vector.extract_strided_slice %2 {offsets = [0, 96], sizes = [8, 32], strides = [1, 1]} : vector<8x128xf32> to vector<8x32xf32>
    %cst_8 = arith.constant 0.000000e+00 : f32
    %26 = vector.broadcast %cst_8 : f32 to vector<8x32xf32>
    %27 = arith.select %24, %25, %26 : vector<8x32xi1>, vector<8x32xf32>
    %28 = arith.addf %22, %27 : vector<8x32xf32>
    %cst_9 = arith.constant 0.000000e+00 : f32
    %29 = vector.broadcast %cst_9 : f32 to vector<8x32xf32>
    %30 = arith.cmpf ogt, %28, %29 : vector<8x32xf32>
    %cst_10 = arith.constant 2.000000e-01 : f32
    %31 = vector.broadcast %cst_10 : f32 to vector<8x32xf32>
    %32 = arith.mulf %31, %28 : vector<8x32xf32>
    %33 = arith.select %30, %28, %32 : vector<8x32xi1>, vector<8x32xf32>
    %c0_11 = arith.constant 0 : index
    %c0_12 = arith.constant 0 : index
    %34 = vector.load %arg4[%c0_11, %c0_12] : memref<8x128xf32, #tpu.memory_space<vmem>>, vector<8x32xf32>
    tpu.vector_store %arg4[%c0_11, %c0_12], %33 {strides = array<i32>} : memref<8x128xf32, #tpu.memory_space<vmem>>, vector<8x32xf32>,
    %c0_13 = arith.constant 0 : index
    %c32 = arith.constant 32 : index
    %35 = vector.load %arg2[%c0_13, %c32] : memref<8x128xbf16, #tpu.memory_space<vmem>>, vector<8x32xbf16>
    %cst_14 = arith.constant dense<0.000000e+00> : vector<8x128xf32>
    %36 = tpu.matmul %35, %0, %cst_14 {dimension_numbers = #tpu.dot_dimension_numbers<[1], [0], [0], [1], [0, 0, 1, 1], [], []>} : vector<8x32xbf16>, vector<32x128xbf16>, vector<8x128xf32> -> vector<8x128xf32>
    %c0_15 = arith.constant 0 : index
    %c1 = arith.constant 1 : index
    %37 = vector.load %arg1[%c0_15, %c1] : memref<8x4xi32, #tpu.memory_space<vmem>>, vector<8x1xi32>
    %38 = vector.shape_cast %37 : vector<8x1xi32> to vector<8x1xi32>
    %39 = vector.broadcast %38 : vector<8x1xi32> to vector<8x32xi32>
    %c0_i32_16 = arith.constant 0 : i32
    %40 = vector.broadcast %c0_i32_16 : i32 to vector<8x32xi32>
    %41 = arith.cmpi eq, %39, %40 : vector<8x32xi32>
    %42 = vector.extract_strided_slice %36 {offsets = [0, 0], sizes = [8, 32], strides = [1, 1]} : vector<8x128xf32> to vector<8x32xf32>
    %cst_17 = arith.constant 0.000000e+00 : f32
    %43 = vector.broadcast %cst_17 : f32 to vector<8x32xf32>
    %44 = arith.select %41, %42, %43 : vector<8x32xi1>, vector<8x32xf32>
    %c1_i32_18 = arith.constant 1 : i32
    %45 = vector.broadcast %c1_i32_18 : i32 to vector<8x32xi32>
    %46 = arith.cmpi eq, %39, %45 : vector<8x32xi32>
    %47 = vector.extract_strided_slice %36 {offsets = [0, 32], sizes = [8, 32], strides = [1, 1]} : vector<8x128xf32> to vector<8x32xf32>
    %cst_19 = arith.constant 0.000000e+00 : f32
    %48 = vector.broadcast %cst_19 : f32 to vector<8x32xf32>
    %49 = arith.select %46, %47, %48 : vector<8x32xi1>, vector<8x32xf32>
    %50 = arith.addf %44, %49 : vector<8x32xf32>
    %c2_i32_20 = arith.constant 2 : i32
    %51 = vector.broadcast %c2_i32_20 : i32 to vector<8x32xi32>
    %52 = arith.cmpi eq, %39, %51 : vector<8x32xi32>
    %53 = vector.extract_strided_slice %36 {offsets = [0, 64], sizes = [8, 32], strides = [1, 1]} : vector<8x128xf32> to vector<8x32xf32>
    %cst_21 = arith.constant 0.000000e+00 : f32
    %54 = vector.broadcast %cst_21 : f32 to vector<8x32xf32>
    %55 = arith.select %52, %53, %54 : vector<8x32xi1>, vector<8x32xf32>
    %56 = arith.addf %50, %55 : vector<8x32xf32>
    %c3_i32_22 = arith.constant 3 : i32
    %57 = vector.broadcast %c3_i32_22 : i32 to vector<8x32xi32>
    %58 = arith.cmpi eq, %39, %57 : vector<8x32xi32>
    %59 = vector.extract_strided_slice %36 {offsets = [0, 96], sizes = [8, 32], strides = [1, 1]} : vector<8x128xf32> to vector<8x32xf32>
    %cst_23 = arith.constant 0.000000e+00 : f32
    %60 = vector.broadcast %cst_23 : f32 to vector<8x32xf32>
    %61 = arith.select %58, %59, %60 : vector<8x32xi1>, vector<8x32xf32>
    %62 = arith.addf %56, %61 : vector<8x32xf32>
    %cst_24 = arith.constant 0.000000e+00 : f32
    %63 = vector.broadcast %cst_24 : f32 to vector<8x32xf32>
    %64 = arith.cmpf ogt, %62, %63 : vector<8x32xf32>
    %cst_25 = arith.constant 2.000000e-01 : f32
    %65 = vector.broadcast %cst_25 : f32 to vector<8x32xf32>
    %66 = arith.mulf %65, %62 : vector<8x32xf32>
    %67 = arith.select %64, %62, %66 : vector<8x32xi1>, vector<8x32xf32>
    %c0_26 = arith.constant 0 : index
    %c32_27 = arith.constant 32 : index
    %68 = vector.load %arg4[%c0_26, %c32_27] : memref<8x128xf32, #tpu.memory_space<vmem>>, vector<8x32xf32>
    tpu.vector_store %arg4[%c0_26, %c32_27], %67 {strides = array<i32>} : memref<8x128xf32, #tpu.memory_space<vmem>>, vector<8x32xf32>,
    %c0_28 = arith.constant 0 : index
    %c64 = arith.constant 64 : index
    %69 = vector.load %arg2[%c0_28, %c64] : memref<8x128xbf16, #tpu.memory_space<vmem>>, vector<8x32xbf16>
    %cst_29 = arith.constant dense<0.000000e+00> : vector<8x128xf32>
    %70 = tpu.matmul %69, %0, %cst_29 {dimension_numbers = #tpu.dot_dimension_numbers<[1], [0], [0], [1], [0, 0, 1, 1], [], []>} : vector<8x32xbf16>, vector<32x128xbf16>, vector<8x128xf32> -> vector<8x128xf32>
    %c0_30 = arith.constant 0 : index
    %c2 = arith.constant 2 : index
    %71 = vector.load %arg1[%c0_30, %c2] : memref<8x4xi32, #tpu.memory_space<vmem>>, vector<8x1xi32>
    %72 = vector.shape_cast %71 : vector<8x1xi32> to vector<8x1xi32>
    %73 = vector.broadcast %72 : vector<8x1xi32> to vector<8x32xi32>
    %c0_i32_31 = arith.constant 0 : i32
    %74 = vector.broadcast %c0_i32_31 : i32 to vector<8x32xi32>
    %75 = arith.cmpi eq, %73, %74 : vector<8x32xi32>
    %76 = vector.extract_strided_slice %70 {offsets = [0, 0], sizes = [8, 32], strides = [1, 1]} : vector<8x128xf32> to vector<8x32xf32>
    %cst_32 = arith.constant 0.000000e+00 : f32
    %77 = vector.broadcast %cst_32 : f32 to vector<8x32xf32>
    %78 = arith.select %75, %76, %77 : vector<8x32xi1>, vector<8x32xf32>
    %c1_i32_33 = arith.constant 1 : i32
    %79 = vector.broadcast %c1_i32_33 : i32 to vector<8x32xi32>
    %80 = arith.cmpi eq, %73, %79 : vector<8x32xi32>
    %81 = vector.extract_strided_slice %70 {offsets = [0, 32], sizes = [8, 32], strides = [1, 1]} : vector<8x128xf32> to vector<8x32xf32>
    %cst_34 = arith.constant 0.000000e+00 : f32
    %82 = vector.broadcast %cst_34 : f32 to vector<8x32xf32>
    %83 = arith.select %80, %81, %82 : vector<8x32xi1>, vector<8x32xf32>
    %84 = arith.addf %78, %83 : vector<8x32xf32>
    %c2_i32_35 = arith.constant 2 : i32
    %85 = vector.broadcast %c2_i32_35 : i32 to vector<8x32xi32>
    %86 = arith.cmpi eq, %73, %85 : vector<8x32xi32>
    %87 = vector.extract_strided_slice %70 {offsets = [0, 64], sizes = [8, 32], strides = [1, 1]} : vector<8x128xf32> to vector<8x32xf32>
    %cst_36 = arith.constant 0.000000e+00 : f32
    %88 = vector.broadcast %cst_36 : f32 to vector<8x32xf32>
    %89 = arith.select %86, %87, %88 : vector<8x32xi1>, vector<8x32xf32>
    %90 = arith.addf %84, %89 : vector<8x32xf32>
    %c3_i32_37 = arith.constant 3 : i32
    %91 = vector.broadcast %c3_i32_37 : i32 to vector<8x32xi32>
    %92 = arith.cmpi eq, %73, %91 : vector<8x32xi32>
    %93 = vector.extract_strided_slice %70 {offsets = [0, 96], sizes = [8, 32], strides = [1, 1]} : vector<8x128xf32> to vector<8x32xf32>
    %cst_38 = arith.constant 0.000000e+00 : f32
    %94 = vector.broadcast %cst_38 : f32 to vector<8x32xf32>
    %95 = arith.select %92, %93, %94 : vector<8x32xi1>, vector<8x32xf32>
    %96 = arith.addf %90, %95 : vector<8x32xf32>
    %cst_39 = arith.constant 0.000000e+00 : f32
    %97 = vector.broadcast %cst_39 : f32 to vector<8x32xf32>
    %98 = arith.cmpf ogt, %96, %97 : vector<8x32xf32>
    %cst_40 = arith.constant 2.000000e-01 : f32
    %99 = vector.broadcast %cst_40 : f32 to vector<8x32xf32>
    %100 = arith.mulf %99, %96 : vector<8x32xf32>
    %101 = arith.select %98, %96, %100 : vector<8x32xi1>, vector<8x32xf32>
    %c0_41 = arith.constant 0 : index
    %c64_42 = arith.constant 64 : index
    %102 = vector.load %arg4[%c0_41, %c64_42] : memref<8x128xf32, #tpu.memory_space<vmem>>, vector<8x32xf32>
    tpu.vector_store %arg4[%c0_41, %c64_42], %101 {strides = array<i32>} : memref<8x128xf32, #tpu.memory_space<vmem>>, vector<8x32xf32>,
    %c0_43 = arith.constant 0 : index
    %c96 = arith.constant 96 : index
    %103 = vector.load %arg2[%c0_43, %c96] : memref<8x128xbf16, #tpu.memory_space<vmem>>, vector<8x32xbf16>
    %cst_44 = arith.constant dense<0.000000e+00> : vector<8x128xf32>
    %104 = tpu.matmul %103, %0, %cst_44 {dimension_numbers = #tpu.dot_dimension_numbers<[1], [0], [0], [1], [0, 0, 1, 1], [], []>} : vector<8x32xbf16>, vector<32x128xbf16>, vector<8x128xf32> -> vector<8x128xf32>
    %c0_45 = arith.constant 0 : index
    %c3 = arith.constant 3 : index
    %105 = vector.load %arg1[%c0_45, %c3] : memref<8x4xi32, #tpu.memory_space<vmem>>, vector<8x1xi32>
    %106 = vector.shape_cast %105 : vector<8x1xi32> to vector<8x1xi32>
    %107 = vector.broadcast %106 : vector<8x1xi32> to vector<8x32xi32>
    %c0_i32_46 = arith.constant 0 : i32
    %108 = vector.broadcast %c0_i32_46 : i32 to vector<8x32xi32>
    %109 = arith.cmpi eq, %107, %108 : vector<8x32xi32>
    %110 = vector.extract_strided_slice %104 {offsets = [0, 0], sizes = [8, 32], strides = [1, 1]} : vector<8x128xf32> to vector<8x32xf32>
    %cst_47 = arith.constant 0.000000e+00 : f32
    %111 = vector.broadcast %cst_47 : f32 to vector<8x32xf32>
    %112 = arith.select %109, %110, %111 : vector<8x32xi1>, vector<8x32xf32>
    %c1_i32_48 = arith.constant 1 : i32
    %113 = vector.broadcast %c1_i32_48 : i32 to vector<8x32xi32>
    %114 = arith.cmpi eq, %107, %113 : vector<8x32xi32>
    %115 = vector.extract_strided_slice %104 {offsets = [0, 32], sizes = [8, 32], strides = [1, 1]} : vector<8x128xf32> to vector<8x32xf32>
    %cst_49 = arith.constant 0.000000e+00 : f32
    %116 = vector.broadcast %cst_49 : f32 to vector<8x32xf32>
    %117 = arith.select %114, %115, %116 : vector<8x32xi1>, vector<8x32xf32>
    %118 = arith.addf %112, %117 : vector<8x32xf32>
    %c2_i32_50 = arith.constant 2 : i32
    %119 = vector.broadcast %c2_i32_50 : i32 to vector<8x32xi32>
    %120 = arith.cmpi eq, %107, %119 : vector<8x32xi32>
    %121 = vector.extract_strided_slice %104 {offsets = [0, 64], sizes = [8, 32], strides = [1, 1]} : vector<8x128xf32> to vector<8x32xf32>
    %cst_51 = arith.constant 0.000000e+00 : f32
    %122 = vector.broadcast %cst_51 : f32 to vector<8x32xf32>
    %123 = arith.select %120, %121, %122 : vector<8x32xi1>, vector<8x32xf32>
    %124 = arith.addf %118, %123 : vector<8x32xf32>
    %c3_i32_52 = arith.constant 3 : i32
    %125 = vector.broadcast %c3_i32_52 : i32 to vector<8x32xi32>
    %126 = arith.cmpi eq, %107, %125 : vector<8x32xi32>
    %127 = vector.extract_strided_slice %104 {offsets = [0, 96], sizes = [8, 32], strides = [1, 1]} : vector<8x128xf32> to vector<8x32xf32>
    %cst_53 = arith.constant 0.000000e+00 : f32
    %128 = vector.broadcast %cst_53 : f32 to vector<8x32xf32>
    %129 = arith.select %126, %127, %128 : vector<8x32xi1>, vector<8x32xf32>
    %130 = arith.addf %124, %129 : vector<8x32xf32>
    %cst_54 = arith.constant 0.000000e+00 : f32
    %131 = vector.broadcast %cst_54 : f32 to vector<8x32xf32>
    %132 = arith.cmpf ogt, %130, %131 : vector<8x32xf32>
    %cst_55 = arith.constant 2.000000e-01 : f32
    %133 = vector.broadcast %cst_55 : f32 to vector<8x32xf32>
    %134 = arith.mulf %133, %130 : vector<8x32xf32>
    %135 = arith.select %132, %130, %134 : vector<8x32xi1>, vector<8x32xf32>
    %c0_56 = arith.constant 0 : index
    %c96_57 = arith.constant 96 : index
    %136 = vector.load %arg4[%c0_56, %c96_57] : memref<8x128xf32, #tpu.memory_space<vmem>>, vector<8x32xf32>
    tpu.vector_store %arg4[%c0_56, %c96_57], %135 {strides = array<i32>} : memref<8x128xf32, #tpu.memory_space<vmem>>, vector<8x32xf32>,
    return
  }
  func.func @transform_0(%arg0: i32) -> (i32, i32) {
    %c0_i32 = arith.constant 0 : i32
    %c0_i32_0 = arith.constant 0 : i32
    %c0_i32_1 = arith.constant 0 : i32
    return %c0_i32, %c0_i32_0 : i32, i32
  }
  func.func @transform_1(%arg0: i32) -> (i32, i32) {
    %c0_i32 = arith.constant 0 : i32
    %c0_i32_0 = arith.constant 0 : i32
    return %arg0, %c0_i32 : i32, i32
  }
  func.func @transform_2(%arg0: i32) -> (i32, i32) {
    %c0_i32 = arith.constant 0 : i32
    %c0_i32_0 = arith.constant 0 : i32
    %c0_i32_1 = arith.constant 0 : i32
    return %c0_i32, %c0_i32_0 : i32, i32
  }
  func.func @transform_3(%arg0: i32) -> (i32, i32) {
    %c0_i32 = arith.constant 0 : i32
    %c0_i32_0 = arith.constant 0 : i32
    return %arg0, %c0_i32 : i32, i32
  }
}

</mosaic_0001>

<bundles_post_ra>
// kernel: tpu_custom_call.1
= control target key start
LH: loop header
LB: loop body
LE: loop exit
PB: predicated region body
PF: predicated region fallthrough
CT: control target
= control target key end

     0   :  { %8 = vsyncpa [#allocation3], 0  ;;  %s605_s0 = inlined_call_operand.vmem [shape: s32[8,4], index: 0, kind: input, shape index: {}]   ;;  %s606_s1 = inlined_call_operand.vmem [shape: bf16[8,128], index: 1, kind: input, shape index: {}]   ;;  %s607_s2 = inlined_call_operand.hbm [shape: bf16[32,128], index: 2, kind: input, shape index: {}]   ;;  %s608_s3 = inlined_call_operand.hbm [shape: f32[8,128], index: 3, kind: output, shape index: {}]  }
   0x1   :  { %9 = vsyncpa [#allocation4], 0  ;;  %s511_s12 = smov [#allocation2]  }
   0x2   :  { %s19_s13 = sshll.u32 %s511_s12, 4  ;;  %s20_s13 = int_to_ptr.vmem [resolvable:$true] %s19_s13 }
   0x3   :  { %s475_s14 = scalar_lea.vmem %s20_s13, 256  ;;  %p480_p1 = scmp.lt.s32.totalorder %s20_s13, %s20_s13 }
   0x4   :  { %p476_p0 = scmp.ne.s32.totalorder %s20_s13, %s475_s14  ;;  %p481_p2 = scmp.lt.s32.totalorder %s475_s14, %s475_s14 }
   0x6   :  { %p482_p3 = por %p481_p2, %p480_p1 }
   0x8   :  { %p483_p4 = pnand %p482_p3, %p476_p0 }
   0xa   :  { %486 = shalt.err (!%p483_p4)
}
   0xb   :  { %s512_s15 = smov 64   ;;  %s513_s16 = smov 4  }
   0xc   :  { %25 = dma.hbm_to_vmem [thread:$0]  %s607_s2, 256, %s20_s13, [#allocation3], %s512_s15, %s512_s15, %s513_s16  }
   0xd   :  { %507 = dma.done.wait [#allocation3], 256  }
   0xe   :  { %508 = vsyncadd [#allocation3], 4294967040  ;;  %v514_v0 = vmov 0.0   ;;  %vm515_vm0 = vmmov 0   ;;  %v516_v1 = vmov 1   ;;  %v517_v2 = vmov 2  }
   0xf   :  { %413 = vmatprep.subr.bf16.mxu0 %v514_v0  ;;  %417 = vmatprep.mubr.msk.bf16.mxu0 %vm515_vm0, %v514_v0  ;;  %v462_v3 = vld [vmem:[%s606_s1] ss:$0 sps:$4 sm:$0xff]   ;;  %s518_s24 = smov 96   ;;  %v465_v6 = vld [vmem:[#allocation2 + $0x8] sm:$0xff]   ;;  %s519_s25 = smov 32   ;;  %vm47_vm1 = vcmask 261120  }
  0x10   :  { %421 = vmatprep.subr.bf16.mxu1 %v514_v0  ;;  %425 = vmatprep.mubr.msk.bf16.mxu1 %vm515_vm0, %v514_v0  ;;  %v463_v4 = vld [vmem:[%s606_s1] ss:$0 sps:$4 sm:$0xff]   ;;  %v520_v10 = vmov 3   ;;  %v521_v11 = vmov 0  }
  0x11   :  { %457 = vset.pattern.permute.xlu1 %v516_v1  ;;  %458 = vset.pattern.permute.xlu0 %v517_v2  ;;  %v464_v5 = vld [vmem:[%s606_s1] ss:$0 sps:$4 sm:$0xff]  }
  0x12   :  { %126 = vrot.lane.b32.xlu0 %v462_v3, %s518_s24  ;;  %296 = vrot.lane.b32.xlu1 %v464_v5, %s519_s25  ;;  %v466_v7 = vld [vmem:[#allocation2] sm:$0xff]  }
  0x13   :  { %414 = vmatpush3.bf16.msra.mxu0 %v465_v6  ;;  %422 = vmatpush3.bf16.msra.mxu1 %v465_v6  ;;  %v171_v8 = vld [vmem:[%s605_s0] sm:$0xff]  ;;  %s522_s0 = smov [#allocation5]  }
  0x14   :  { %415 = vmatprep.subr.bf16.mxu0 %v514_v0  ;;  %423 = vmatprep.subr.bf16.mxu1 %v514_v0  ;;  %v34_v9 = vld [vmem:[%s606_s1] sm:$0xf]  ;;  %s383_s1 = sshll.u32 %s522_s0, 4  ;;  %s384_s1 = int_to_ptr.vmem [resolvable:$true] %s383_s1 }
  0x15   :  { %s487_s30 = scalar_lea.vmem %s384_s1, 128  ;;  %p492_p6 = scmp.lt.s32.totalorder %s384_s1, %s384_s1 }
  0x16   :  { %211 = vrot.lane.b32.xlu0 %v463_v4, %s512_s15  ;;  %173 = vperm.xlu1 %457, %v171_v8   ;;  %p488_p5 = scmp.ne.s32.totalorder %s384_s1, %s487_s30  ;;  %p493_p7 = scmp.lt.s32.totalorder %s487_s30, %s487_s30 }
  0x17   :  { %416 = vmatpush3.bf16.msra.mxu0 %v466_v7  ;;  %424 = vmatpush3.bf16.msra.mxu1 %v466_v7 }
  0x18   :  { %429 = vmatprep.subr.bf16.mxu0 %v514_v0  ;;  %437 = vmatprep.subr.bf16.mxu1 %v514_v0  ;;  %p494_p8 = por %p493_p7, %p492_p6 }
  0x1a   :  { %258 = vperm.xlu0 %458, %v171_v8   ;;  %418 = vmatmul.mubr.msk.bf16.vlgmr.msra.gmra.mxu0 %vm47_vm1, %v34_v9  ;;  %p495_p9 = pnand %p494_p8, %p488_p5 }
  0x1b   :  { %459 = vset.pattern.permute.xlu1 %v520_v10  ;;  %430 = vmatpush3.bf16.msra.mxu0 %v465_v6 }
  0x1c   :  { %433 = vmatprep.mubr.msk.bf16.mxu0 %vm515_vm0, %v514_v0  ;;  %431 = vmatprep.subr.bf16.mxu0 %v514_v0 }
  0x1d   :  { %343 = vperm.xlu1 %459, %v171_v8  }
  0x1e   :  { %461 = vset.pattern.permute.xlu0 %v520_v10 }
  0x1f   :  { %432 = vmatpush3.bf16.msra.mxu0 %v466_v7 }
  0x21   :  { %460 = vset.pattern.permute.xlu1 %v521_v11 }
  0x22   :  { %93 = vperm.xlu1 %460, %v171_v8  }
  0x84   :  { %v127_v12 = vpop.permute.xlu0 %126  ;;  %v297_v14 = vpop.permute.xlu1 %296 }
  0x85   :  { %426 = vmatmul.mubr.msk.bf16.vlgmr.msra.gmra.mxu1 %vm47_vm1, %v127_v12 }
  0x86   :  { %438 = vmatpush3.bf16.msra.mxu1 %v465_v6  ;;  %441 = vmatprep.mubr.msk.bf16.mxu1 %vm515_vm0, %v514_v0 }
  0x87   :  { %439 = vmatprep.subr.bf16.mxu1 %v514_v0 }
  0x88   :  { %v212_v13 = vpop.permute.xlu0 %211 }
  0x89   :  { %434 = vmatmul.mubr.msk.bf16.vlgmr.msra.gmra.mxu0 %vm47_vm1, %v212_v13 }
  0x8a   :  { %440 = vmatpush3.bf16.msra.mxu1 %v466_v7 }
  0x8d   :  { %442 = vmatmul.mubr.msk.bf16.vlgmr.msra.gmra.mxu1 %vm47_vm1, %v297_v14 }
  0x91   :  { %v174_v19 = vpop.permute.xlu1 %173 }
  0x92   :  { %vm177_vm2 = vcmp.eq.s32.totalorder %v174_v19, 1  ;;  %vm175_vm3 = vcmp.eq.s32.totalorder %v174_v19, 0  ;;  %vm184_vm4 = vcmp.eq.s32.totalorder %v174_v19, 2  ;;  %vm191_vm7 = vcmp.eq.s32.totalorder %v174_v19, 3 }
  0x95   :  { %v576_v20 = vpop.permute.xlu0 %258 }
  0x96   :  { %vm262_vm5 = vcmp.eq.s32.totalorder %v576_v20, 1  ;;  %vm269_vm6 = vcmp.eq.s32.totalorder %v576_v20, 2  ;;  %vm276_vm12 = vcmp.eq.s32.totalorder %v576_v20, 3  ;;  %vm260_vm0 = vcmp.eq.s32.totalorder %v576_v20, 0 }
  0x98   :  { %v344_v27 = vpop.permute.xlu1 %343 }
  0x99   :  { %vm345_vm8 = vcmp.eq.s32.totalorder %v344_v27, 0  ;;  %vm354_vm9 = vcmp.eq.s32.totalorder %v344_v27, 2  ;;  %vm347_vm10 = vcmp.eq.s32.totalorder %v344_v27, 1  ;;  %vm361_vm11 = vcmp.eq.s32.totalorder %v344_v27, 3 }
  0x9d   :  { %v94_v43 = vpop.permute.xlu1 %93 }
  0x9e   :  { %vm104_vm13 = vcmp.eq.s32.totalorder %v94_v43, 2  ;;  %vm97_vm14 = vcmp.eq.s32.totalorder %v94_v43, 1  ;;  %vm111_vm15 = vcmp.eq.s32.totalorder %v94_v43, 3 }
  0xda   :  { %v574_v15 = vpop.f32.mrf.mxu0 }
  0xdb   :  { %v105_v46 = vsel %vm104_vm13, %v574_v15, 0.0  ;;  %v98_v47 = vsel %vm97_vm14, %v574_v15, 0.0  ;;  %v112_v48 = vsel %vm111_vm15, %v574_v15, 0.0 }
  0xdc   :  { %v419_v16 = vpop.f32.mrf.mxu0 }
  0xde   :  { %v88_v17 = vpop.f32.mrf.mxu0 }
  0xe0   :  { %v420_v18 = vpop.f32.mrf.mxu0 }
 0x145   :  { %v165_v21 = vpop.f32.mrf.mxu1 }
 0x146   :  { %v178_v22 = vsel %vm177_vm2, %v165_v21, 0.0  ;;  %v176_v23 = vsel %vm175_vm3, %v165_v21, 0.0  ;;  %v185_v28 = vsel %vm184_vm4, %v165_v21, 0.0  ;;  %v192_v35 = vsel %vm191_vm7, %v165_v21, 0.0 }
 0x147   :  { %180 = vrot.lane.b32.xlu0 %v178_v22, %s518_s24  ;;  %v427_v24 = vpop.f32.mrf.mxu1  ;;  %vm95_vm3 = vcmp.eq.s32.totalorder %v94_v43, 0  ;;  %vm205_vm7 = vcmask 523520  }
 0x148   :  { %v96_v8 = vsel %vm95_vm3, %v574_v15, 0.0 }
 0x149   :  { %v168_v25 = vpop.f32.mrf.mxu1  ;;  %v250_v26 = vpop.f32.mrf.mxu0 }
 0x14a   :  { %v263_v29 = vsel %vm262_vm5, %v250_v26, 0.0  ;;  %v270_v34 = vsel %vm269_vm6, %v250_v26, 0.0  ;;  %v277_v45 = vsel %vm276_vm12, %v250_v26, 0.0  ;;  %v261_v58 = vsel %vm260_vm0, %v250_v26, 0.0 }
 0x14b   :  { %187 = vrot.lane.b32.xlu0 %v185_v28, %s512_s15  ;;  %v428_v30 = vpop.f32.mrf.mxu1  ;;  %265 = vrot.lane.b32.xlu1 %v263_v29, %s518_s24  ;;  %v435_v31 = vpop.f32.mrf.mxu0 }
 0x14d   :  { %v253_v32 = vpop.f32.mrf.mxu0  ;;  %v335_v33 = vpop.f32.mrf.mxu1 }
 0x14e   :  { %v346_v36 = vsel %vm345_vm8, %v335_v33, 0.0  ;;  %v355_v39 = vsel %vm354_vm9, %v335_v33, 0.0  ;;  %v348_v40 = vsel %vm347_vm10, %v335_v33, 0.0  ;;  %v362_v44 = vsel %vm361_vm11, %v335_v33, 0.0 }
 0x14f   :  { %v443_v37 = vpop.f32.mrf.mxu1  ;;  %272 = vrot.lane.b32.xlu0 %v270_v34, %s512_s15  ;;  %194 = vrot.lane.b32.xlu1 %v192_v35, %s519_s25  ;;  %v436_v38 = vpop.f32.mrf.mxu0  ;;  %vm290_vm8 = vcmask 785920   ;;  %vm375_vm9 = vcmask 1048320  }
 0x151   :  { %v338_v41 = vpop.f32.mrf.mxu1 }
 0x153   :  { %v444_v42 = vpop.f32.mrf.mxu1  ;;  %357 = vrot.lane.b32.xlu0 %v355_v39, %s512_s15  ;;  %350 = vrot.lane.b32.xlu1 %v348_v40, %s518_s24 }
 0x157   :  { %364 = vrot.lane.b32.xlu0 %v362_v44, %s519_s25  ;;  %279 = vrot.lane.b32.xlu1 %v277_v45, %s519_s25 }
 0x15b   :  { %107 = vrot.lane.b32.xlu0 %v105_v46, %s512_s15  ;;  %100 = vrot.lane.b32.xlu1 %v98_v47, %s518_s24 }
 0x15f   :  { %114 = vrot.lane.b32.xlu1 %v112_v48, %s519_s25 }
 0x1b9   :  { %v181_v49 = vpop.permute.xlu0 %180 }
 0x1ba   :  { %v183_v52 = vadd.f32 %v181_v49, %v176_v23 }
 0x1bd   :  { %v188_v50 = vpop.permute.xlu0 %187  ;;  %v266_v51 = vpop.permute.xlu1 %265 }
 0x1be   :  { %v190_v53 = vadd.f32 %v188_v50, %v183_v52  ;;  %v268_v61 = vadd.f32 %v266_v51, %v261_v58 }
 0x1c1   :  { %v273_v54 = vpop.permute.xlu0 %272  ;;  %v195_v55 = vpop.permute.xlu1 %194 }
 0x1c2   :  { %v197_v56 = vadd.f32 %v195_v55, %v190_v53  ;;  %v275_v0 = vadd.f32 %v273_v54, %v268_v61 }
 0x1c4   :  { %v199_v57 = vmul.f32 0.2, %v197_v56  ;;  %vm198_vm2 = vcmp.gt.f32.partialorder %v197_v56, 0.0 }
 0x1c5   :  { %v358_v59 = vpop.permute.xlu0 %357  ;;  %v351_v60 = vpop.permute.xlu1 %350 }
 0x1c6   :  { %v353_v62 = vadd.f32 %v351_v60, %v346_v36  ;;  %v200_v63 = vsel %vm198_vm2, %v197_v56, %v199_v57 }
 0x1c7   :  { %202 = vrot.lane.b32.xlu0 %v200_v63, %s519_s25 }
 0x1c8   :  { %v360_v1 = vadd.f32 %v358_v59, %v353_v62 }
 0x1c9   :  { %v365_v2 = vpop.permute.xlu0 %364  ;;  %v280_v3 = vpop.permute.xlu1 %279 }
 0x1ca   :  { %v367_v4 = vadd.f32 %v365_v2, %v360_v1  ;;  %v282_v5 = vadd.f32 %v280_v3, %v275_v0 }
 0x1cc   :  { %v369_v6 = vmul.f32 0.2, %v367_v4  ;;  %vm368_vm4 = vcmp.gt.f32.partialorder %v367_v4, 0.0  ;;  %vm283_vm5 = vcmp.gt.f32.partialorder %v282_v5, 0.0  ;;  %v284_v7 = vmul.f32 0.2, %v282_v5 }
 0x1cd   :  { %v101_v9 = vpop.permute.xlu1 %100  ;;  %v108_v13 = vpop.permute.xlu0 %107 }
 0x1ce   :  { %v103_v10 = vadd.f32 %v101_v9, %v96_v8  ;;  %v370_v11 = vsel %vm368_vm4, %v367_v4, %v369_v6  ;;  %v285_v12 = vsel %vm283_vm5, %v282_v5, %v284_v7 }
 0x1cf   :  { %372 = vrot.lane.b32.xlu0 %v370_v11, %s518_s24  ;;  %287 = vrot.lane.b32.xlu1 %v285_v12, %s512_s15 }
 0x1d0   :  { %v110_v14 = vadd.f32 %v108_v13, %v103_v10 }
 0x1d1   :  { %v115_v16 = vpop.permute.xlu1 %114 }
 0x1d2   :  { %v117_v17 = vadd.f32 %v115_v16, %v110_v14 }
 0x1d4   :  { %vm118_vm6 = vcmp.gt.f32.partialorder %v117_v17, 0.0  ;;  %v119_v18 = vmul.f32 0.2, %v117_v17 }
 0x1d6   :  { %v120_v19 = vsel %vm118_vm6, %v117_v17, %v119_v18 }
 0x1d7   :  { %121 = vst.msk [vmem:[#allocation5] sm:$0xff] %vm47_vm1, %v120_v19 }
 0x239   :  { %v203_v20 = vpop.permute.xlu0 %202 }
 0x23a   :  { %206 = vst.msk [vmem:[#allocation5] sm:$0xff] %vm205_vm7, %v203_v20 }
 0x241   :  { %v373_v15 = vpop.permute.xlu0 %372  ;;  %v288_v21 = vpop.permute.xlu1 %287 }
 0x242   :  { %291 = vst.msk [vmem:[#allocation5] sm:$0xff] %vm290_vm8, %v288_v21 }
 0x243   :  { %376 = vst.msk [vmem:[#allocation5] sm:$0xff] %vm375_vm9, %v373_v15 }
 0x244   :  { %498 = shalt.err (!%p495_p9)
}
 0x245   :  { %386 = dma.vmem_to_hbm [thread:$0]  %s384_s1, 128, %s608_s3, [#allocation4]  }
 0x246   :  { %509 = dma.done.wait [#allocation4], 128  }
 0x247   :  { %510 = vsyncadd [#allocation4], 4294967168 }
 0x248   :  { %390 = vsyncpa [#allocation3], 1 }
 0x249   :  { %391 = vsyncpa [#allocation4], 1 }

</bundles_post_ra>
